<compile_context>
chip_gen: v5e
topology: v5e:2x2
jax: 0.10.0
libtpu: 0.0.40
codegen_flags: <defaults>
</compile_context>

<pallas_src>
import math

import jax
import jax.numpy as jnp
from jax.experimental import pallas as pl
from jax.experimental.pallas import tpu as pltpu

_MiB = 1024 * 1024


def _round_up(x, m):
    return (x + m - 1) // m * m


def _cdiv(a, b):
    return -(-a // b)


def _vmem_capacity_bytes():
    """Physical VMEM per core; conservative v7x fallback if the query fails."""
    try:
        return int(pltpu.get_tpu_info().vmem_capacity_bytes)
    except Exception:
        return 64 * _MiB


def _gelu(h, approximate):
    if approximate:
        # tanh-approx GELU -> EUP (separate VLIW slot, essentially free).
        return jax.nn.gelu(h, approximate=True)
    # Exact erf form, matching nn.GELU() default bit-for-bit (slower: VALU poly).
    return 0.5 * h * (1.0 + jax.lax.erf(h * (1.0 / math.sqrt(2.0))))


# ---------------------------------------------------------------------------
# Kernels
# ---------------------------------------------------------------------------
def _make_resident_kernel(approx_gelu):
    """Single d_ff chunk: weights are grid-invariant -> fetched once, VMEM-resident."""

    def kernel(x_ref, w1_ref, b1_ref, w2_ref, b2_ref, o_ref):
        x = x_ref[...].astype(jnp.bfloat16)                     # cast tile in-kernel
        h = jnp.dot(x, w1_ref[...], preferred_element_type=jnp.float32) + b1_ref[...]
        h = _gelu(h, approx_gelu)
        # dropout_layer: identity at inference time.
        # TODO(synk): training-mode dropout (p=0.1) would use pltpu.prng_random_bits.
        out = jnp.dot(h.astype(jnp.bfloat16), w2_ref[...],
                      preferred_element_type=jnp.float32)
        o_ref[...] = (out + b2_ref[...]).astype(o_ref.dtype)

    return kernel


def _make_chunked_kernel(approx_gelu):
    """d_ff tiled as innermost 'arbitrary' axis with f32 VMEM accumulator."""

    def kernel(x_ref, w1_ref, b1_ref, w2_ref, b2_ref, o_ref, acc_ref):
        @pl.when(pl.program_id(1) == 0)
        def _():
            acc_ref[...] = jnp.zeros_like(acc_ref)

        x = x_ref[...].astype(jnp.bfloat16)
        h = jnp.dot(x, w1_ref[...], preferred_element_type=jnp.float32) + b1_ref[...]
        h = _gelu(h, approx_gelu)
        # dropout_layer: identity at inference time.
        acc_ref[...] += jnp.dot(h.astype(jnp.bfloat16), w2_ref[...],
                                preferred_element_type=jnp.float32)

        @pl.when(pl.program_id(1) == pl.num_programs(1) - 1)
        def _():
            o_ref[...] = (acc_ref[...] + b2_ref[...]).astype(o_ref.dtype)

    return kernel


# ---------------------------------------------------------------------------
# Planning helpers
# ---------------------------------------------------------------------------
def _hidden_plan(d_embed, d_ff):
    """Decide weight residency vs d_ff chunking and the VMEM limit, per generation."""
    vmem = _vmem_capacity_bytes()
    # ~96 MiB on 128-MiB parts (v5e/v6e), ~48 MiB on 64-MiB v7x.
    vmem_limit = min(vmem * 3 // 4, 100 * _MiB)

    w_bytes = 4 * d_embed * d_ff                 # W1 + W2 in bf16
    # Resident if double-buffered weights leave headroom for x/h/out tiles.
    resident = 2 * w_bytes <= int(vmem_limit * 0.8)

    if resident:
        # Keep d_ff MXU/lane aligned (multiple of 128) when it is large.
        d_ff_pad = d_ff if d_ff <= 128 else _round_up(d_ff, 128)
        tf_eff = d_ff_pad
    else:
        tf_eff = 1024 if vmem >= 96 * _MiB else 512
        tf_eff = min(tf_eff, _round_up(d_ff, 256))
        d_ff_pad = _round_up(d_ff, tf_eff)
    return resident, tf_eff, d_ff_pad, vmem_limit


def _pick_tm(M, d_embed, tf_eff, x_bytes, out_bytes, need_acc, vmem_limit):
    """Pick a row-tile size that fits VMEM, minimizes M padding and (when M is
    large enough) gives >= 2 tiles so the parallel axis shards across v7x's 2 TCs."""
    budget = int(vmem_limit * 0.9)
    # Double-buffered bf16 weights + biases (grid-invariant weights may be kept
    # single-buffered by Mosaic, but budget conservatively for 2 buffers).
    fixed = 8 * d_embed * tf_eff + 2 * (tf_eff + d_embed) * 4

    def fits(tm):
        b = fixed
        b += 2 * tm * d_embed * x_bytes          # x tiles (double-buffered)
        b += 2 * tm * d_embed * out_bytes        # out tiles (double-buffered)
        b += tm * tf_eff * 6                     # h temporary: f32 + bf16 copy
        if need_acc:
            b += tm * d_embed * 4                # f32 accumulator scratch
        return b <= budget

    # Tiny-M fast path: one tile covering all rows (sublane-aligned).
    small = _round_up(max(M, 1), 8)
    if small <= 128 and fits(small):
        return small

    cands = [t for t in (1024, 768, 512, 384, 256, 128) if fits(t)]
    if not cands:
        for t in (64, 32, 16, 8):
            if fits(t):
                return t
        return 8
    # Prefer >= 2 M tiles so megacore / 2-TC sharding has work on both cores.
    multi = [t for t in cands if _cdiv(M, t) >= 2]
    if multi:
        cands = multi
    # Minimize padded waste; tie-break on the larger tile.
    return min(cands, key=lambda t: (_cdiv(M, t) * t - M, -t))


# ---------------------------------------------------------------------------
# Forward
# ---------------------------------------------------------------------------
def _ffn_forward(x, w1b, b1_2d, w2b, b2_2d, *, resident, tf_eff, vmem_limit,
                 d_ff_logical, approx_gelu):
    batch_shape = x.shape[:-1]
    d_embed = x.shape[-1]
    d_ff_pad = w1b.shape[1]
    M = int(math.prod(batch_shape)) if batch_shape else 1
    out_dtype = x.dtype

    x2d = x.reshape(M, d_embed)
    x_bytes = x.dtype.itemsize
    out_bytes = jnp.dtype(out_dtype).itemsize

    tm_eff = _pick_tm(M, d_embed, tf_eff, x_bytes, out_bytes,
                      need_acc=not resident, vmem_limit=vmem_limit)
    M_pad = _round_up(M, tm_eff)
    if M_pad != M:
        # Remainder rows only; tm is chosen to keep this small.
        x2d = jnp.pad(x2d, ((0, M_pad - M), (0, 0)))
    n_m = M_pad // tm_eff

    if resident:
        grid = (n_m,)
        in_specs = [
            pl.BlockSpec((tm_eff, d_embed), lambda i: (i, 0)),        # x rows
            pl.BlockSpec((d_embed, d_ff_pad), lambda i: (0, 0)),      # W1 (resident)
            pl.BlockSpec((1, d_ff_pad), lambda i: (0, 0)),            # b1
            pl.BlockSpec((d_ff_pad, d_embed), lambda i: (0, 0)),      # W2 (resident)
            pl.BlockSpec((1, d_embed), lambda i: (0, 0)),             # b2
        ]
        out_specs = pl.BlockSpec((tm_eff, d_embed), lambda i: (i, 0))
        scratch = []
        kernel = _make_resident_kernel(approx_gelu)
        dims = ("parallel",)
        weight_fetches = 1
    else:
        n_f = d_ff_pad // tf_eff
        grid = (n_m, n_f)
        in_specs = [
            pl.BlockSpec((tm_eff, d_embed), lambda i, f: (i, 0)),     # x rows
            pl.BlockSpec((d_embed, tf_eff), lambda i, f: (0, f)),     # W1 chunk
            pl.BlockSpec((1, tf_eff), lambda i, f: (0, f)),           # b1 chunk
            pl.BlockSpec((tf_eff, d_embed), lambda i, f: (f, 0)),     # W2 chunk
            pl.BlockSpec((1, d_embed), lambda i, f: (0, 0)),          # b2
        ]
        out_specs = pl.BlockSpec((tm_eff, d_embed), lambda i, f: (i, 0))
        scratch = [pltpu.VMEM((tm_eff, d_embed), jnp.float32)]
        kernel = _make_chunked_kernel(approx_gelu)
        dims = ("parallel", "arbitrary")
        weight_fetches = n_m   # weights re-streamed once per M tile

    cost = pl.CostEstimate(
        flops=4 * M * d_embed * d_ff_logical,
        transcendentals=M * d_ff_logical,
        bytes_accessed=(x2d.size * x_bytes
                        + weight_fetches * (w1b.size + w2b.size) * 2
                        + b1_2d.size * 4 + b2_2d.size * 4
                        + M_pad * d_embed * out_bytes),
    )

    out2d = pl.pallas_call(
        kernel,
        out_shape=jax.ShapeDtypeStruct((M_pad, d_embed), out_dtype),
        grid_spec=pltpu.PrefetchScalarGridSpec(
            num_scalar_prefetch=0,
            grid=grid,
            in_specs=in_specs,
            out_specs=out_specs,
            scratch_shapes=scratch,
        ),
        compiler_params=pltpu.CompilerParams(
            dimension_semantics=dims,
            vmem_limit_bytes=int(vmem_limit),
        ),
        cost_estimate=cost,
    )(x2d, w1b, b1_2d, w2b, b2_2d)

    if M_pad != M:
        out2d = out2d[:M]
    return out2d.reshape(*batch_shape, d_embed)


def make_position_wise_ffn(w1, b1, w2, b2, *, approximate_gelu=True):
    """One-time setup: plan tiling and pre-convert weights to bf16 / biases to f32
    (padding d_ff once if needed), then return a forward callable ffn(x).

    w1: (d_embed, d_ff), b1: (d_ff,), w2: (d_ff, d_embed), b2: (d_embed,).
    """
    d_embed, d_ff = w1.shape
    resident, tf_eff, d_ff_pad, vmem_limit = _hidden_plan(d_embed, d_ff)

    # Parameter-load-time conversion (no per-call cast/pad HBM passes).
    w1b = w1.astype(jnp.bfloat16)
    w2b = w2.astype(jnp.bfloat16)
    b1f = b1.astype(jnp.float32)
    b2f = b2.astype(jnp.float32)
    if d_ff_pad != d_ff:
        # Zero-padded hidden columns are exact: GELU(0 + 0) = 0 and zero W2 rows
        # contribute nothing to the second matmul.
        w1b = jnp.pad(w1b, ((0, 0), (0, d_ff_pad - d_ff)))
        b1f = jnp.pad(b1f, ((0, d_ff_pad - d_ff),))
        w2b = jnp.pad(w2b, ((0, d_ff_pad - d_ff), (0, 0)))
    b1_2d = b1f.reshape(1, d_ff_pad)
    b2_2d = b2f.reshape(1, d_embed)

    def ffn(x):
        return _ffn_forward(x, w1b, b1_2d, w2b, b2_2d,
                            resident=resident, tf_eff=tf_eff,
                            vmem_limit=vmem_limit, d_ff_logical=d_ff,
                            approx_gelu=approximate_gelu)

    return ffn


def init_params(key, d_embed, d_ff):
    """Deterministic init mimicking nn.Linear default (uniform +/- 1/sqrt(fan_in))."""
    k1, k2, k3, k4 = jax.random.split(key, 4)
    lim1 = 1.0 / math.sqrt(d_embed)
    lim2 = 1.0 / math.sqrt(d_ff)
    w1 = jax.random.uniform(k1, (d_embed, d_ff), jnp.float32, -lim1, lim1)
    b1 = jax.random.uniform(k2, (d_ff,), jnp.float32, -lim1, lim1)
    w2 = jax.random.uniform(k3, (d_ff, d_embed), jnp.float32, -lim2, lim2)
    b2 = jax.random.uniform(k4, (d_embed,), jnp.float32, -lim2, lim2)
    return w1, b1, w2, b2


if __name__ == "__main__":
    batch, seq, d_embed, d_ff = 2, 8, 32, 64
    key = jax.random.PRNGKey(0)
    kx, kp = jax.random.split(key)
    x = jax.random.normal(kx, (batch, seq, d_embed), jnp.float32)
    w1, b1, w2, b2 = init_params(kp, d_embed, d_ff)

    ffn = make_position_wise_ffn(w1, b1, w2, b2)
    out = jax.block_until_ready(ffn(x))

    # Reference in plain f32 JAX using the exact-erf GELU of nn.GELU().  The
    # kernel uses bf16 MXU operands + tanh-approx GELU, so tolerances are
    # relaxed accordingly (tanh vs erf GELU differ by < 3e-3 absolute).
    h_ref = x @ w1 + b1
    h_ref = 0.5 * h_ref * (1.0 + jax.lax.erf(h_ref / math.sqrt(2.0)))
    ref = h_ref @ w2 + b2
    assert out.shape == (batch, seq, d_embed)
    max_err = float(jnp.max(jnp.abs(out - ref)))
    assert jnp.allclose(out, ref, atol=2e-2, rtol=2e-2), max_err

    print("KERNEL_OK")
</pallas_src>

<mosaic_0001>
module attributes {stable_mosaic.version = 11 : i64} {
  func.func @kernel(%arg0: i32, %arg1: memref<16x32xf32, #tpu.memory_space<vmem>>, %arg2: memref<32x64xbf16, #tpu.memory_space<vmem>>, %arg3: memref<1x64xf32, #tpu.memory_space<vmem>>, %arg4: memref<64x32xbf16, #tpu.memory_space<vmem>>, %arg5: memref<1x32xf32, #tpu.memory_space<vmem>>, %arg6: memref<16x32xf32, #tpu.memory_space<vmem>>) attributes {dimension_semantics = [#tpu.dimension_semantics<parallel>], iteration_bounds = array<i64: 1>, scalar_prefetch = 0 : i64, scratch_operands = 0 : i64, tpu.core_type = #tpu.core_type<tc>, window_params = [{transform_indices = @transform_0, window_bounds = array<i64: 16, 32>}, {pipeline_mode = #tpu.pipeline_mode<synchronous>, transform_indices = @transform_1, window_bounds = array<i64: 32, 64>}, {pipeline_mode = #tpu.pipeline_mode<synchronous>, transform_indices = @transform_2, window_bounds = array<i64: 1, 64>}, {pipeline_mode = #tpu.pipeline_mode<synchronous>, transform_indices = @transform_3, window_bounds = array<i64: 64, 32>}, {pipeline_mode = #tpu.pipeline_mode<synchronous>, transform_indices = @transform_4, window_bounds = array<i64: 1, 32>}, {transform_indices = @transform_5, window_bounds = array<i64: 16, 32>}]} {
    %c0 = arith.constant 0 : index
    %c0_0 = arith.constant 0 : index
    %0 = vector.load %arg1[%c0, %c0_0] : memref<16x32xf32, #tpu.memory_space<vmem>>, vector<16x32xf32>
    %1 = arith.truncf %0 : vector<16x32xf32> to vector<16x32xbf16>
    %c0_1 = arith.constant 0 : index
    %c0_2 = arith.constant 0 : index
    %2 = vector.load %arg2[%c0_1, %c0_2] : memref<32x64xbf16, #tpu.memory_space<vmem>>, vector<32x64xbf16>
    %cst = arith.constant dense<0.000000e+00> : vector<16x64xf32>
    %3 = tpu.matmul %1, %2, %cst {dimension_numbers = #tpu.dot_dimension_numbers<[1], [0], [0], [1], [0, 0, 1, 1], [], []>} : vector<16x32xbf16>, vector<32x64xbf16>, vector<16x64xf32> -> vector<16x64xf32>
    %c0_3 = arith.constant 0 : index
    %c0_4 = arith.constant 0 : index
    %4 = vector.load %arg3[%c0_3, %c0_4] : memref<1x64xf32, #tpu.memory_space<vmem>>, vector<1x64xf32>
    %5 = vector.broadcast %4 : vector<1x64xf32> to vector<16x64xf32>
    %6 = arith.addf %3, %5 : vector<16x64xf32>
    %7 = arith.mulf %6, %6 : vector<16x64xf32>
    %8 = arith.mulf %6, %7 : vector<16x64xf32>
    %cst_5 = arith.constant 4.471500e-02 : f32
    %9 = vector.broadcast %cst_5 : f32 to vector<16x64xf32>
    %10 = arith.mulf %9, %8 : vector<16x64xf32>
    %11 = arith.addf %6, %10 : vector<16x64xf32>
    %cst_6 = arith.constant 0.797884583 : f32
    %12 = vector.broadcast %cst_6 : f32 to vector<16x64xf32>
    %13 = arith.mulf %12, %11 : vector<16x64xf32>
    %14 = math.tanh %13 : vector<16x64xf32>
    %cst_7 = arith.constant 1.000000e+00 : f32
    %15 = vector.broadcast %cst_7 : f32 to vector<16x64xf32>
    %16 = arith.addf %15, %14 : vector<16x64xf32>
    %cst_8 = arith.constant 5.000000e-01 : f32
    %17 = vector.broadcast %cst_8 : f32 to vector<16x64xf32>
    %18 = arith.mulf %17, %16 : vector<16x64xf32>
    %19 = arith.mulf %6, %18 : vector<16x64xf32>
    %20 = arith.truncf %19 : vector<16x64xf32> to vector<16x64xbf16>
    %c0_9 = arith.constant 0 : index
    %c0_10 = arith.constant 0 : index
    %21 = vector.load %arg4[%c0_9, %c0_10] : memref<64x32xbf16, #tpu.memory_space<vmem>>, vector<64x32xbf16>
    %cst_11 = arith.constant dense<0.000000e+00> : vector<16x32xf32>
    %22 = tpu.matmul %20, %21, %cst_11 {dimension_numbers = #tpu.dot_dimension_numbers<[1], [0], [0], [1], [0, 0, 1, 1], [], []>} : vector<16x64xbf16>, vector<64x32xbf16>, vector<16x32xf32> -> vector<16x32xf32>
    %c0_12 = arith.constant 0 : index
    %c0_13 = arith.constant 0 : index
    %23 = vector.load %arg5[%c0_12, %c0_13] : memref<1x32xf32, #tpu.memory_space<vmem>>, vector<1x32xf32>
    %24 = vector.broadcast %23 : vector<1x32xf32> to vector<16x32xf32>
    %25 = arith.addf %22, %24 : vector<16x32xf32>
    %c0_14 = arith.constant 0 : index
    %c0_15 = arith.constant 0 : index
    %26 = vector.load %arg6[%c0_14, %c0_15] : memref<16x32xf32, #tpu.memory_space<vmem>>, vector<16x32xf32>
    tpu.vector_store %arg6[%c0_14, %c0_15], %25 {strides = array<i32>} : memref<16x32xf32, #tpu.memory_space<vmem>>, vector<16x32xf32>,
    return
  }
  func.func @transform_0(%arg0: i32) -> (i32, i32) {
    %c0_i32 = arith.constant 0 : i32
    %c0_i32_0 = arith.constant 0 : i32
    return %arg0, %c0_i32 : i32, i32
  }
  func.func @transform_1(%arg0: i32) -> (i32, i32) {
    %c0_i32 = arith.constant 0 : i32
    %c0_i32_0 = arith.constant 0 : i32
    %c0_i32_1 = arith.constant 0 : i32
    return %c0_i32, %c0_i32_0 : i32, i32
  }
  func.func @transform_2(%arg0: i32) -> (i32, i32) {
    %c0_i32 = arith.constant 0 : i32
    %c0_i32_0 = arith.constant 0 : i32
    %c0_i32_1 = arith.constant 0 : i32
    return %c0_i32, %c0_i32_0 : i32, i32
  }
  func.func @transform_3(%arg0: i32) -> (i32, i32) {
    %c0_i32 = arith.constant 0 : i32
    %c0_i32_0 = arith.constant 0 : i32
    %c0_i32_1 = arith.constant 0 : i32
    return %c0_i32, %c0_i32_0 : i32, i32
  }
  func.func @transform_4(%arg0: i32) -> (i32, i32) {
    %c0_i32 = arith.constant 0 : i32
    %c0_i32_0 = arith.constant 0 : i32
    %c0_i32_1 = arith.constant 0 : i32
    return %c0_i32, %c0_i32_0 : i32, i32
  }
  func.func @transform_5(%arg0: i32) -> (i32, i32) {
    %c0_i32 = arith.constant 0 : i32
    %c0_i32_0 = arith.constant 0 : i32
    return %arg0, %c0_i32 : i32, i32
  }
}

</mosaic_0001>

<bundles_post_ra>
// kernel: tpu_custom_call.1
= control target key start
LH: loop header
LB: loop body
LE: loop exit
PB: predicated region body
PF: predicated region fallthrough
CT: control target
= control target key end

     0   :  { %s292_s0 = inlined_call_operand.vmem [shape: f32[16,32], index: 0, kind: input, shape index: {}]   ;;  %s293_s1 = inlined_call_operand.vmem [shape: bf16[32,64], index: 1, kind: input, shape index: {}]   ;;  %s294_s2 = inlined_call_operand.vmem [shape: f32[1,64], index: 2, kind: input, shape index: {}]   ;;  %s295_s3 = inlined_call_operand.vmem [shape: bf16[64,32], index: 3, kind: input, shape index: {}]   ;;  %s296_s4 = inlined_call_operand.vmem [shape: f32[1,32], index: 4, kind: input, shape index: {}]   ;;  %s297_s5 = inlined_call_operand.hbm [shape: f32[16,32], index: 5, kind: output, shape index: {}]  }
   0x1   :  { %v183_v0 = vld [vmem:[%s293_s1 + $0x8] sm:$0xff]  ;;  %v182_v1 = vld [vmem:[%s293_s1] sm:$0xff] }
   0x2   :  { %v22_v2 = vld [vmem:[%s292_s0] sm:$0xff]  ;;  %55 = vmatpush.bf16.msra.mxu0 %v183_v0  ;;  %v23_v3 = vld [vmem:[%s292_s0 + $0x8] sm:$0xff] }
   0x3   :  { %10 = vsyncpa [#allocation3], 0  ;;  %v24_v4 = vpack.c.bf16 %v23_v3, %v22_v2  ;;  %vm45_vm0 = vcmask 261120   ;;  %v187_v5 = vld [vmem:[%s295_s3 + $0x18] sm:$0xff]  ;;  %v186_v6 = vld [vmem:[%s295_s3 + $0x10] sm:$0xff]  ;;  %vm118_vm1 = vcmask 523264  }
   0x4   :  { %126 = vmatpush.bf16.msra.mxu1 %v187_v5  ;;  %v185_v7 = vld [vmem:[%s295_s3 + $0x8] sm:$0xff]  ;;  %v191_v8 = vld [vmem:[%s294_s2] ss:$0 sm:$0xff]  ;;  %s223_s9 = smov [#allocation2]   ;;  %s144_s13 = sshll.u32 %s297_s5, 4  ;;  %s145_s13 = int_to_ptr.hbm [resolvable:$true] %s144_s13 }
   0x5   :  { %v184_v9 = vld [vmem:[%s295_s3] sm:$0xff]  ;;  %s142_s10 = sshll.u32 %s223_s9, 4  ;;  %s224_s14 = smov 128   ;;  %s143_s10 = int_to_ptr.vmem [resolvable:$true] %s142_s10 }
   0x6   :  { %56 = vmatpush.bf16.msra.mxu0 %v182_v1  ;;  %v192_v33 = vld [vmem:[%s296_s4] ss:$0 sm:$0xff]  ;;  %s225_s15 = smov 8  }
   0x8   :  { %127 = vmatpush.bf16.msra.mxu1 %v186_v6 }
   0x9   :  { %164 = vmatmul.msk.bf16.vlgmr.msra.gmra.mxu0 %vm45_vm0, %v24_v4 }
   0xc   :  { %128 = vmatpush.bf16.msra.mxu1 %v185_v7 }
  0x10   :  { %129 = vmatpush.bf16.msra.mxu1 %v184_v9 }
  0x86   :  { %v58_v10 = vpop.f32.mrf.mxu0 }
  0x87   :  { %v59_v11 = vadd.f32 %v191_v8, %v58_v10 }
  0x89   :  { %v63_v12 = vmul.f32 %v59_v11, %v59_v11 }
  0x8b   :  { %v65_v13 = vmul.f32 %v63_v12, %v59_v11 }
  0x8d   :  { %v67_v14 = vmul.f32 0.044715, %v65_v13 }
  0x8e   :  { %v60_v15 = vpop.f32.mrf.mxu0 }
  0x8f   :  { %v69_v16 = vadd.f32 %v67_v14, %v59_v11  ;;  %v61_v17 = vadd.f32 %v191_v8, %v60_v15 }
  0x91   :  { %v71_v18 = vmul.f32 0.7978846, %v69_v16  ;;  %v64_v19 = vmul.f32 %v61_v17, %v61_v17 }
  0x93   :  { %v66_v20 = vmul.f32 %v64_v19, %v61_v17  ;;  %193 = vtanh.f32 %v71_v18 }
  0x95   :  { %v68_v21 = vmul.f32 0.044715, %v66_v20 }
  0x97   :  { %v70_v22 = vadd.f32 %v68_v21, %v61_v17 }
  0x99   :  { %v72_v23 = vmul.f32 0.7978846, %v70_v22  ;;  %v194_v24 = vpop.eup %193 }
  0x9a   :  { %v75_v25 = vadd.f32 1.0, %v194_v24 }
  0x9b   :  { %195 = vtanh.f32 %v72_v23 }
  0x9c   :  { %v77_v28 = vmul.f32 0.5, %v75_v25 }
  0x9e   :  { %v79_v30 = vmul.f32 %v77_v28, %v59_v11 }
  0xa1   :  { %v196_v26 = vpop.eup %195 }
  0xa2   :  { %v76_v27 = vadd.f32 1.0, %v196_v26 }
  0xa4   :  { %v78_v29 = vmul.f32 0.5, %v76_v27 }
  0xa6   :  { %v80_v31 = vmul.f32 %v78_v29, %v61_v17 }
  0xa8   :  { %v81_v32 = vpack.c.bf16 %v80_v31, %v79_v30 }
  0xaa   :  { %181 = vmatmul.msk.bf16.vlgmr.msra.gmra.mxu1 %vm118_vm1, %v81_v32 }
 0x127   :  { %v131_v34 = vpop.f32.mrf.mxu1 }
 0x128   :  { %v132_v35 = vadd.f32 %v192_v33, %v131_v34 }
 0x12a   :  { %136 = vst.msk [vmem:[#allocation2] sm:$0xff] %vm45_vm0, %v132_v35 }
 0x12f   :  { %v133_v36 = vpop.f32.mrf.mxu1 }
 0x130   :  { %v134_v37 = vadd.f32 %v192_v33, %v133_v36 }
 0x132   :  { %137 = vst.msk [vmem:[#allocation2 + $0x8] sm:$0xff] %vm45_vm0, %v134_v37 }
 0x133   :  { %150 = dma.vmem_to_hbm [thread:$0]  %s143_s10, 256, %s145_s13, [#allocation3], %s224_s14, %s224_s14, %s225_s15  }
 0x134   :  { %221 = dma.done.wait [#allocation3], 256  }
 0x135   :  { %222 = vsyncadd [#allocation3], 4294967040 }
 0x136   :  { %155 = vsyncpa [#allocation3], 1 }

</bundles_post_ra>
